<compile_context>
chip_gen: v7x
topology: tpu7x:2x2x1
jax: 0.10.0
libtpu: 0.0.40
codegen_flags: <defaults>
</compile_context>

<pallas_src>
import functools

import jax
import jax.numpy as jnp
from jax.experimental import pallas as pl
from jax.experimental.pallas import tpu as pltpu

DIM = 128


def _round_up(x, m):
    return (x + m - 1) // m * m


def encoder_kernel(x_ref, w1_ref, b1_ref, w2_ref, b2_ref, w3_ref, b3_ref, o_ref):
    """Fused 3-layer MLP. bf16 operands, f32 MXU accumulation, f32 bias/relu."""
    h = jnp.dot(x_ref[...], w1_ref[...], preferred_element_type=jnp.float32)
    h = jnp.maximum(h + b1_ref[...], 0.0).astype(w2_ref.dtype)

    h = jnp.dot(h, w2_ref[...], preferred_element_type=jnp.float32)
    h = jnp.maximum(h + b2_ref[...], 0.0).astype(w3_ref.dtype)

    out = jnp.dot(h, w3_ref[...], preferred_element_type=jnp.float32) + b3_ref[...]
    o_ref[...] = out.astype(o_ref.dtype)


@functools.partial(jax.jit, static_argnames=("block_b", "compute_dtype"))
def encoder_forward(x, w1, b1, w2, b2, w3, b3, *, block_b=512,
                    compute_dtype=jnp.bfloat16):
    """x: [B, o_dim] float32.  Returns [B, h_dim] float32."""
    B, o_dim = x.shape
    h_dim = w3.shape[1]
    out_dtype = x.dtype

    # Batch tile: multiple of 8 sublanes, no larger than the (padded) batch.
    bb = int(min(block_b, _round_up(B, 8)))
    bb = _round_up(max(bb, 8), 8)
    B_pad = _round_up(B, bb)

    # Lane-dense output: pad fc3 out-dim to a multiple of 128.
    h_pad = _round_up(h_dim, 128)

    xc = x.astype(compute_dtype)
    if B_pad != B:
        xc = jnp.pad(xc, ((0, B_pad - B), (0, 0)))

    w1c = w1.astype(compute_dtype)
    w2c = w2.astype(compute_dtype)
    w3c = w3.astype(compute_dtype)
    b1c = b1.astype(jnp.float32)
    b2c = b2.astype(jnp.float32)
    b3c = b3.astype(jnp.float32)
    if h_pad != h_dim:
        w3c = jnp.pad(w3c, ((0, 0), (0, h_pad - h_dim)))
        b3c = jnp.pad(b3c, ((0, 0), (0, h_pad - h_dim)))

    grid = (B_pad // bb,)

    wbytes = jnp.dtype(compute_dtype).itemsize
    cost = pl.CostEstimate(
        flops=2 * B_pad * (o_dim * DIM + DIM * DIM + DIM * h_pad),
        transcendentals=0,
        bytes_accessed=(B_pad * o_dim * wbytes
                        + B_pad * h_pad * jnp.dtype(out_dtype).itemsize
                        + (o_dim * DIM + DIM * DIM + DIM * h_pad) * wbytes
                        + (DIM + DIM + h_pad) * 4),
    )

    out = pl.pallas_call(
        encoder_kernel,
        out_shape=jax.ShapeDtypeStruct((B_pad, h_pad), out_dtype),
        grid_spec=pltpu.PrefetchScalarGridSpec(
            num_scalar_prefetch=0,
            grid=grid,
            in_specs=[
                # x: tile over batch, full feature dim
                pl.BlockSpec((bb, o_dim), lambda i: (i, 0)),
                # weights / biases: full arrays, resident across all grid steps
                pl.BlockSpec((o_dim, DIM), lambda i: (0, 0)),
                pl.BlockSpec((1, DIM), lambda i: (0, 0)),
                pl.BlockSpec((DIM, DIM), lambda i: (0, 0)),
                pl.BlockSpec((1, DIM), lambda i: (0, 0)),
                pl.BlockSpec((DIM, h_pad), lambda i: (0, 0)),
                pl.BlockSpec((1, h_pad), lambda i: (0, 0)),
            ],
            out_specs=pl.BlockSpec((bb, h_pad), lambda i: (i, 0)),
        ),
        compiler_params=pltpu.CompilerParams(
            dimension_semantics=("parallel",),
        ),
        cost_estimate=cost,
    )(xc, w1c, b1c, w2c, b2c, w3c, b3c)

    return out[:B, :h_dim]


def init_params(key, o_dim, h_dim):
    """nn.Linear-style U(-1/sqrt(fan_in), 1/sqrt(fan_in)) init.

    Weights stored as [in_dim, out_dim] (transposed vs PyTorch)."""
    ks = jax.random.split(key, 6)

    def linear(kw, kb, fan_in, fan_out):
        bound = 1.0 / jnp.sqrt(fan_in)
        w = jax.random.uniform(kw, (fan_in, fan_out), jnp.float32, -bound, bound)
        b = jax.random.uniform(kb, (1, fan_out), jnp.float32, -bound, bound)
        return w, b

    w1, b1 = linear(ks[0], ks[1], o_dim, DIM)
    w2, b2 = linear(ks[2], ks[3], DIM, DIM)
    w3, b3 = linear(ks[4], ks[5], DIM, h_dim)
    return w1, b1, w2, b2, w3, b3


def encoder_ref_mixed(x, w1, b1, w2, b2, w3, b3, compute_dtype=jnp.bfloat16):
    """Pure-JAX reference mirroring the kernel's bf16/f32 precision scheme."""
    xc = x.astype(compute_dtype)
    w1c, w2c, w3c = (w.astype(compute_dtype) for w in (w1, w2, w3))
    h = jnp.dot(xc, w1c, preferred_element_type=jnp.float32) + b1
    h = jnp.maximum(h, 0.0).astype(compute_dtype)
    h = jnp.dot(h, w2c, preferred_element_type=jnp.float32) + b2
    h = jnp.maximum(h, 0.0).astype(compute_dtype)
    return jnp.dot(h, w3c, preferred_element_type=jnp.float32) + b3


def encoder_ref_f32(x, w1, b1, w2, b2, w3, b3):
    h = jax.nn.relu(x @ w1 + b1)
    h = jax.nn.relu(h @ w2 + b2)
    return h @ w3 + b3


if __name__ == "__main__":
    # Small shapes consistent with the module: o_dim=32, h_dim=32
    B, o_dim, h_dim = 16, 32, 32

    key = jax.random.PRNGKey(0)
    k_x, k_p = jax.random.split(key)

    x = jax.random.normal(k_x, (B, o_dim), dtype=jnp.float32)
    params = init_params(k_p, o_dim, h_dim)

    # Default path: single large batch tile (bb capped at the padded batch).
    out = jax.block_until_ready(encoder_forward(x, *params))
    assert out.shape == (B, h_dim), out.shape
    ref_mixed = encoder_ref_mixed(x, *params)
    ref_f32 = encoder_ref_f32(x, *params)
    assert jnp.allclose(out, ref_mixed, atol=2e-2, rtol=2e-2), "mismatch vs bf16 ref"
    assert jnp.allclose(out, ref_f32, atol=1e-1, rtol=1e-1), "mismatch vs f32 ref"

    # Multi-step grid + batch-remainder path (B=20 not a multiple of block_b=8).
    B2 = 20
    x2 = jax.random.normal(k_x, (B2, o_dim), dtype=jnp.float32)
    out2 = jax.block_until_ready(encoder_forward(x2, *params, block_b=8))
    assert out2.shape == (B2, h_dim), out2.shape
    ref2 = encoder_ref_mixed(x2, *params)
    assert jnp.allclose(out2, ref2, atol=2e-2, rtol=2e-2), "mismatch (tiled/padded)"

    print("KERNEL_OK")
</pallas_src>

<mosaic_0001>
module attributes {stable_mosaic.version = 11 : i64} {
  func.func @encoder_kernel(%arg0: i32, %arg1: memref<16x32xbf16, #tpu.memory_space<vmem>>, %arg2: memref<32x128xbf16, #tpu.memory_space<vmem>>, %arg3: memref<1x128xf32, #tpu.memory_space<vmem>>, %arg4: memref<128x128xbf16, #tpu.memory_space<vmem>>, %arg5: memref<1x128xf32, #tpu.memory_space<vmem>>, %arg6: memref<128x128xbf16, #tpu.memory_space<vmem>>, %arg7: memref<1x128xf32, #tpu.memory_space<vmem>>, %arg8: memref<16x128xf32, #tpu.memory_space<vmem>>) attributes {dimension_semantics = [#tpu.dimension_semantics<parallel>], iteration_bounds = array<i64: 1>, scalar_prefetch = 0 : i64, scratch_operands = 0 : i64, tpu.core_type = #tpu.core_type<tc>, window_params = [{transform_indices = @transform_0, window_bounds = array<i64: 16, 32>}, {pipeline_mode = #tpu.pipeline_mode<synchronous>, transform_indices = @transform_1, window_bounds = array<i64: 32, 128>}, {pipeline_mode = #tpu.pipeline_mode<synchronous>, transform_indices = @transform_2, window_bounds = array<i64: 1, 128>}, {pipeline_mode = #tpu.pipeline_mode<synchronous>, transform_indices = @transform_3, window_bounds = array<i64: 128, 128>}, {pipeline_mode = #tpu.pipeline_mode<synchronous>, transform_indices = @transform_4, window_bounds = array<i64: 1, 128>}, {pipeline_mode = #tpu.pipeline_mode<synchronous>, transform_indices = @transform_5, window_bounds = array<i64: 128, 128>}, {pipeline_mode = #tpu.pipeline_mode<synchronous>, transform_indices = @transform_6, window_bounds = array<i64: 1, 128>}, {transform_indices = @transform_7, window_bounds = array<i64: 16, 128>}]} {
    %c0 = arith.constant 0 : index
    %c0_0 = arith.constant 0 : index
    %0 = vector.load %arg1[%c0, %c0_0] : memref<16x32xbf16, #tpu.memory_space<vmem>>, vector<16x32xbf16>
    %c0_1 = arith.constant 0 : index
    %c0_2 = arith.constant 0 : index
    %1 = vector.load %arg2[%c0_1, %c0_2] : memref<32x128xbf16, #tpu.memory_space<vmem>>, vector<32x128xbf16>
    %cst = arith.constant dense<0.000000e+00> : vector<16x128xf32>
    %2 = tpu.matmul %0, %1, %cst {dimension_numbers = #tpu.dot_dimension_numbers<[1], [0], [0], [1], [0, 0, 1, 1], [], []>} : vector<16x32xbf16>, vector<32x128xbf16>, vector<16x128xf32> -> vector<16x128xf32>
    %c0_3 = arith.constant 0 : index
    %c0_4 = arith.constant 0 : index
    %3 = vector.load %arg3[%c0_3, %c0_4] : memref<1x128xf32, #tpu.memory_space<vmem>>, vector<1x128xf32>
    %4 = vector.broadcast %3 : vector<1x128xf32> to vector<16x128xf32>
    %5 = arith.addf %2, %4 : vector<16x128xf32>
    %cst_5 = arith.constant 0.000000e+00 : f32
    %6 = vector.broadcast %cst_5 : f32 to vector<16x128xf32>
    %7 = arith.maximumf %5, %6 : vector<16x128xf32>
    %8 = arith.truncf %7 : vector<16x128xf32> to vector<16x128xbf16>
    %c0_6 = arith.constant 0 : index
    %c0_7 = arith.constant 0 : index
    %9 = vector.load %arg4[%c0_6, %c0_7] : memref<128x128xbf16, #tpu.memory_space<vmem>>, vector<128x128xbf16>
    %cst_8 = arith.constant dense<0.000000e+00> : vector<16x128xf32>
    %10 = tpu.matmul %8, %9, %cst_8 {dimension_numbers = #tpu.dot_dimension_numbers<[1], [0], [0], [1], [0, 0, 1, 1], [], []>} : vector<16x128xbf16>, vector<128x128xbf16>, vector<16x128xf32> -> vector<16x128xf32>
    %c0_9 = arith.constant 0 : index
    %c0_10 = arith.constant 0 : index
    %11 = vector.load %arg5[%c0_9, %c0_10] : memref<1x128xf32, #tpu.memory_space<vmem>>, vector<1x128xf32>
    %12 = vector.broadcast %11 : vector<1x128xf32> to vector<16x128xf32>
    %13 = arith.addf %10, %12 : vector<16x128xf32>
    %cst_11 = arith.constant 0.000000e+00 : f32
    %14 = vector.broadcast %cst_11 : f32 to vector<16x128xf32>
    %15 = arith.maximumf %13, %14 : vector<16x128xf32>
    %16 = arith.truncf %15 : vector<16x128xf32> to vector<16x128xbf16>
    %c0_12 = arith.constant 0 : index
    %c0_13 = arith.constant 0 : index
    %17 = vector.load %arg6[%c0_12, %c0_13] : memref<128x128xbf16, #tpu.memory_space<vmem>>, vector<128x128xbf16>
    %cst_14 = arith.constant dense<0.000000e+00> : vector<16x128xf32>
    %18 = tpu.matmul %16, %17, %cst_14 {dimension_numbers = #tpu.dot_dimension_numbers<[1], [0], [0], [1], [0, 0, 1, 1], [], []>} : vector<16x128xbf16>, vector<128x128xbf16>, vector<16x128xf32> -> vector<16x128xf32>
    %c0_15 = arith.constant 0 : index
    %c0_16 = arith.constant 0 : index
    %19 = vector.load %arg7[%c0_15, %c0_16] : memref<1x128xf32, #tpu.memory_space<vmem>>, vector<1x128xf32>
    %20 = vector.broadcast %19 : vector<1x128xf32> to vector<16x128xf32>
    %21 = arith.addf %18, %20 : vector<16x128xf32>
    %c0_17 = arith.constant 0 : index
    %c0_18 = arith.constant 0 : index
    %22 = vector.load %arg8[%c0_17, %c0_18] : memref<16x128xf32, #tpu.memory_space<vmem>>, vector<16x128xf32>
    tpu.vector_store %arg8[%c0_17, %c0_18], %21 {strides = array<i32>} : memref<16x128xf32, #tpu.memory_space<vmem>>, vector<16x128xf32>,
    return
  }
  func.func @transform_0(%arg0: i32) -> (i32, i32) {
    %c0_i32 = arith.constant 0 : i32
    %c0_i32_0 = arith.constant 0 : i32
    return %arg0, %c0_i32 : i32, i32
  }
  func.func @transform_1(%arg0: i32) -> (i32, i32) {
    %c0_i32 = arith.constant 0 : i32
    %c0_i32_0 = arith.constant 0 : i32
    %c0_i32_1 = arith.constant 0 : i32
    return %c0_i32, %c0_i32_0 : i32, i32
  }
  func.func @transform_2(%arg0: i32) -> (i32, i32) {
    %c0_i32 = arith.constant 0 : i32
    %c0_i32_0 = arith.constant 0 : i32
    %c0_i32_1 = arith.constant 0 : i32
    return %c0_i32, %c0_i32_0 : i32, i32
  }
  func.func @transform_3(%arg0: i32) -> (i32, i32) {
    %c0_i32 = arith.constant 0 : i32
    %c0_i32_0 = arith.constant 0 : i32
    %c0_i32_1 = arith.constant 0 : i32
    return %c0_i32, %c0_i32_0 : i32, i32
  }
  func.func @transform_4(%arg0: i32) -> (i32, i32) {
    %c0_i32 = arith.constant 0 : i32
    %c0_i32_0 = arith.constant 0 : i32
    %c0_i32_1 = arith.constant 0 : i32
    return %c0_i32, %c0_i32_0 : i32, i32
  }
  func.func @transform_5(%arg0: i32) -> (i32, i32) {
    %c0_i32 = arith.constant 0 : i32
    %c0_i32_0 = arith.constant 0 : i32
    %c0_i32_1 = arith.constant 0 : i32
    return %c0_i32, %c0_i32_0 : i32, i32
  }
  func.func @transform_6(%arg0: i32) -> (i32, i32) {
    %c0_i32 = arith.constant 0 : i32
    %c0_i32_0 = arith.constant 0 : i32
    %c0_i32_1 = arith.constant 0 : i32
    return %c0_i32, %c0_i32_0 : i32, i32
  }
  func.func @transform_7(%arg0: i32) -> (i32, i32) {
    %c0_i32 = arith.constant 0 : i32
    %c0_i32_0 = arith.constant 0 : i32
    return %arg0, %c0_i32 : i32, i32
  }
}

</mosaic_0001>

<bundles_post_ra>
// kernel: encoder_forward.1
= control target key start
LH: loop header
LB: loop body
LE: loop exit
PB: predicated region body
PF: predicated region fallthrough
CT: control target
= control target key end

     0   :  { %v491_v1 = vmov 0.0   ;;  %vm492_vm0 = vmmov 0   ;;  %vm58_vm1 = vcmask 261120   ;;  %s638_s0 = inlined_call_operand.vmem [shape: bf16[16,32], index: 0, kind: input, shape index: {}]   ;;  %s639_s1 = inlined_call_operand.vmem [shape: bf16[32,128], index: 1, kind: input, shape index: {}]   ;;  %s640_s2 = inlined_call_operand.vmem [shape: f32[1,128], index: 2, kind: input, shape index: {}]   ;;  %s641_s3 = inlined_call_operand.vmem [shape: bf16[128,128], index: 3, kind: input, shape index: {}]   ;;  %s642_s4 = inlined_call_operand.vmem [shape: f32[1,128], index: 4, kind: input, shape index: {}]   ;;  %s643_s5 = inlined_call_operand.vmem [shape: bf16[128,128], index: 5, kind: input, shape index: {}]   ;;  %s644_s6 = inlined_call_operand.vmem [shape: f32[1,128], index: 6, kind: input, shape index: {}]   ;;  %s645_s7 = inlined_call_operand.hbm [shape: f32[16,128], index: 7, kind: output, shape index: {}]  }
   0x1   :  { %v448_v0 = vld [vmem:[%s639_s1] sm:$0xff]   ;;  %395 = vmatprep.subr.bf16.mxu0 %v491_v1  ;;  %403 = vmatprep.subr.bf16.mxu1 %v491_v1  ;;  %v449_v2 = vld [vmem:[%s639_s1 + $0x8] sm:$0xff]   ;;  %v453_v6 = vld [vmem:[%s641_s3 + $0x10] sm:$0xff]  }
   0x2   :  { %396 = vmatpush3.bf16.msra.mxu0 %v448_v0  ;;  %399 = vmatprep.mubr.msk.bf16.mxu0 %vm492_vm0, %v491_v1  ;;  %v451_v3 = vld [vmem:[%s641_s3] sm:$0xff]   ;;  %v452_v5 = vld [vmem:[%s641_s3 + $0x8] sm:$0xff]   ;;  %v454_v7 = vld [vmem:[%s641_s3 + $0x18] sm:$0xff]  }
   0x3   :  { %397 = vmatprep.subr.bf16.mxu0 %v491_v1  ;;  %419 = vmatprep.mubr.msk.bf16.mxu1 %vm492_vm0, %v491_v1  ;;  %v450_v4 = vld [vmem:[%s638_s0] sm:$0xff]  }
   0x4   :  { %404 = vmatpush3.bf16.msra.mxu1 %v451_v3 }
   0x5   :  { %405 = vmatprep.subr.bf16.mxu1 %v491_v1 }
   0x6   :  { %398 = vmatpush3.bf16.msra.mxu0 %v449_v2 }
   0x7   :  { %423 = vmatprep.subr.bf16.mxu0 %v491_v1 }
   0x8   :  { %406 = vmatpush3.bf16.msra.mxu1 %v452_v5 }
   0x9   :  { %400 = vmatmul.mubr.msk.bf16.vlgmr.msra.gmra.mrb[0].mxu0 %vm58_vm1, %v450_v4  ;;  %407 = vmatprep.subr.bf16.mxu1 %v491_v1 }
   0xa   :  { %439 = vmatprep.mubr.msk.bf16.mxu0 %vm492_vm0, %v491_v1 }
   0xc   :  { %408 = vmatpush3.bf16.msra.mxu1 %v453_v6 }
   0xd   :  { %409 = vmatprep.subr.bf16.mxu1 %v491_v1 }
   0xe   :  { %12 = vsyncpa [#allocation3], 0  ;;  %v455_v8 = vld [vmem:[%s641_s3 + $0x20] sm:$0xff]   ;;  %v456_v9 = vld [vmem:[%s641_s3 + $0x28] sm:$0xff]  }
   0xf   :  { %v457_v10 = vld [vmem:[%s641_s3 + $0x30] sm:$0xff]   ;;  %v458_v11 = vld [vmem:[%s641_s3 + $0x38] sm:$0xff]   ;;  %v459_v12 = vld [vmem:[%s643_s5] sm:$0xff]  }
  0x10   :  { %410 = vmatpush3.bf16.msra.mxu1 %v454_v7  ;;  %424 = vmatpush3.bf16.msra.mxu0 %v459_v12  ;;  %v460_v13 = vld [vmem:[%s643_s5 + $0x8] sm:$0xff]   ;;  %v461_v14 = vld [vmem:[%s643_s5 + $0x10] sm:$0xff]   ;;  %v462_v15 = vld [vmem:[%s643_s5 + $0x18] sm:$0xff]  }
  0x11   :  { %411 = vmatprep.subr.bf16.mxu1 %v491_v1  ;;  %425 = vmatprep.subr.bf16.mxu0 %v491_v1  ;;  %v463_v16 = vld [vmem:[%s643_s5 + $0x20] sm:$0xff]   ;;  %v464_v17 = vld [vmem:[%s643_s5 + $0x28] sm:$0xff]   ;;  %v465_v28 = vld [vmem:[%s643_s5 + $0x30] sm:$0xff]  }
  0x12   :  { %v351_v18 = vld [vmem:[%s640_s2] ss:$0 sm:$0xff]  ;;  %v466_v29 = vld [vmem:[%s643_s5 + $0x38] sm:$0xff]   ;;  %s493_s5 = smov [#allocation2]  }
  0x13   :  { %v356_v30 = vld [vmem:[%s642_s4] ss:$0 sm:$0xff]  ;;  %s340_s16 = sshll.u32 %s493_s5, 4  ;;  %s341_s16 = int_to_ptr.vmem [resolvable:$true] %s340_s16 }
  0x14   :  { %412 = vmatpush3.bf16.msra.mxu1 %v455_v8  ;;  %426 = vmatpush3.bf16.msra.mxu0 %v460_v13  ;;  %v365_v40 = vld [vmem:[%s644_s6] ss:$0 sm:$0xff]  ;;  %s467_s4 = scalar_lea.vmem %s341_s16, 256  ;;  %p472_p1 = scmp.lt.s32.totalorder %s341_s16, %s341_s16 }
  0x15   :  { %413 = vmatprep.subr.bf16.mxu1 %v491_v1  ;;  %427 = vmatprep.subr.bf16.mxu0 %v491_v1  ;;  %p468_p0 = scmp.ne.s32.totalorder %s341_s16, %s467_s4  ;;  %p473_p2 = scmp.lt.s32.totalorder %s467_s4, %s467_s4 }
  0x17   :  { %p474_p3 = por %p473_p2, %p472_p1 }
  0x18   :  { %414 = vmatpush3.bf16.msra.mxu1 %v456_v9  ;;  %428 = vmatpush3.bf16.msra.mxu0 %v461_v14 }
  0x19   :  { %415 = vmatprep.subr.bf16.mxu1 %v491_v1  ;;  %429 = vmatprep.subr.bf16.mxu0 %v491_v1  ;;  %p475_p4 = pnand %p474_p3, %p468_p0 }
  0x1c   :  { %416 = vmatpush3.bf16.msra.mxu1 %v457_v10  ;;  %430 = vmatpush3.bf16.msra.mxu0 %v462_v15 }
  0x1d   :  { %417 = vmatprep.subr.bf16.mxu1 %v491_v1  ;;  %431 = vmatprep.subr.bf16.mxu0 %v491_v1 }
  0x20   :  { %418 = vmatpush3.bf16.msra.mxu1 %v458_v11  ;;  %432 = vmatpush3.bf16.msra.mxu0 %v463_v16 }
  0x21   :  { %433 = vmatprep.subr.bf16.mxu0 %v491_v1 }
  0x24   :  { %434 = vmatpush3.bf16.msra.mxu0 %v464_v17 }
  0x25   :  { %435 = vmatprep.subr.bf16.mxu0 %v491_v1 }
  0x28   :  { %436 = vmatpush3.bf16.msra.mxu0 %v465_v28 }
  0x29   :  { %437 = vmatprep.subr.bf16.mxu0 %v491_v1 }
  0x2c   :  { %438 = vmatpush3.bf16.msra.mxu0 %v466_v29 }
  0xdc   :  { %v96_v19 = vpop.f32.mrb[0].mxu0 }
  0xdd   :  { %v97_v20 = vadd.f32 %v351_v18, %v96_v19  ;;  %v401_v21 = vpop.f32.mrb[1].mxu0 }
  0xde   :  { %v99_v22 = vpop.f32.mrb[2].mxu0 }
  0xdf   :  { %v100_v23 = vadd.f32 %v351_v18, %v99_v22  ;;  %v402_v24 = vpop.f32.mrb[3].mxu0  ;;  %v103_v25 = vmax.f32 %v97_v20, 0.0 }
  0xe1   :  { %v104_v26 = vmax.f32 %v100_v23, 0.0 }
  0xe3   :  { %v105_v27 = vpack.c.bf16 %v104_v26, %v103_v25 }
  0xe5   :  { %420 = vmatmul.mubr.bf16.vlgmr.msra.gmra.mrb[0].mxu1 %v105_v27 }
 0x1b8   :  { %v211_v31 = vpop.f32.mrb[0].mxu1 }
 0x1b9   :  { %v212_v32 = vadd.f32 %v356_v30, %v211_v31  ;;  %v421_v33 = vpop.f32.mrb[1].mxu1 }
 0x1ba   :  { %v214_v34 = vpop.f32.mrb[2].mxu1 }
 0x1bb   :  { %v215_v35 = vadd.f32 %v356_v30, %v214_v34  ;;  %v422_v36 = vpop.f32.mrb[3].mxu1  ;;  %v218_v37 = vmax.f32 %v212_v32, 0.0 }
 0x1bd   :  { %v219_v38 = vmax.f32 %v215_v35, 0.0 }
 0x1bf   :  { %v220_v39 = vpack.c.bf16 %v219_v38, %v218_v37 }
 0x1c1   :  { %440 = vmatmul.mubr.bf16.vlgmr.msra.gmra.mrb[4].mxu0 %v220_v39 }
 0x294   :  { %v326_v41 = vpop.f32.mrb[4].mxu0 }
 0x295   :  { %v327_v42 = vadd.f32 %v365_v40, %v326_v41  ;;  %v441_v43 = vpop.f32.mrb[5].mxu0 }
 0x296   :  { %v329_v44 = vpop.f32.mrb[6].mxu0 }
 0x297   :  { %333 = vst [vmem:[#allocation2] sm:$0xff] %v327_v42  ;;  %v330_v45 = vadd.f32 %v365_v40, %v329_v44  ;;  %v442_v46 = vpop.f32.mrb[7].mxu0 }
 0x299   :  { %334 = vst [vmem:[#allocation2 + $0x8] sm:$0xff] %v330_v45 }
 0x29a   :  { %478 = shalt.err (!%p475_p4)
}
 0x29b   :  { %s479_s18 = scalar_lea.hbm %s645_s7, 256 }
 0x29c   :  { %p480_p5 = scmp.ne.s32.totalorder %s645_s7, %s479_s18  ;;  %p483_p6 = scmp.lt.u32.totalorder %s479_s18, %s645_s7 }
 0x29e   :  { %p485_p7 = pnand %p483_p6, %p480_p5 }
 0x2a0   :  { %488 = shalt.err (!%p485_p7)
}
 0x2a1   :  { %s494_s23 = smov 128   ;;  %s495_s24 = smov 8  }
 0x2a2   :  { %346 = dma.vmem_to_hbm [thread:$0]  %s341_s16, 256, %s645_s7, [#allocation3], %s494_s23, %s494_s23, %s495_s24  }
 0x2a3   :  { %489 = dma.done.wait [#allocation3], 256  }
 0x2a4   :  { %490 = vsyncadd [#allocation3], 4294967040 }
 0x2a5   :  { %350 = vsyncpa [#allocation3], 1 }

</bundles_post_ra>
